<compile_context>
chip_gen: v7x
topology: tpu7x:2x2x1
jax: 0.10.0
libtpu: 0.0.40
codegen_flags: <defaults>
</compile_context>

<pallas_src>
import numpy as np
import jax
import jax.numpy as jnp
from jax.experimental import pallas as pl
from jax.experimental.pallas import tpu as pltpu


# -------------------- fused LSTM-cell kernel --------------------
def _lstm_cell_kernel(x_ref, h_ref, c_ref, wx_ref, wh_ref, b_ref, h_out_ref, c_out_ref):
    H = h_ref.shape[-1]
    # Two MXU matmuls -> one lane-dense [tb, 4H] gate slab, f32 accumulation.
    gates = (
        jnp.dot(x_ref[...], wx_ref[...], preferred_element_type=jnp.float32)
        + jnp.dot(h_ref[...], wh_ref[...], preferred_element_type=jnp.float32)
        + b_ref[...]
    )
    # Gate order along the 4H axis: [input, forget, cell, output]  (static lane slices).
    i_t = jax.nn.sigmoid(gates[:, 0 * H:1 * H])
    f_t = jax.nn.sigmoid(gates[:, 1 * H:2 * H])
    g_t = jnp.tanh(gates[:, 2 * H:3 * H])
    o_t = jax.nn.sigmoid(gates[:, 3 * H:4 * H])

    c_t = f_t * c_ref[...] + i_t * g_t
    h_out_ref[...] = o_t * jnp.tanh(c_t)
    c_out_ref[...] = c_t


# -------------------- pallas_call wrapper --------------------
def lstm_cell(x_t, h_prev, c_prev, wx, wh, b, *, block_b=None):
    """One LSTMCell step.

    x_t:    [B, In]    wx: [In, 4H]
    h_prev: [B, H]     wh: [H,  4H]
    c_prev: [B, H]     b : [1,  4H]   (sum of input-gate and hidden-gate biases)
    returns (h_t, c_t), each [B, H]
    """
    B, In = x_t.shape
    H = h_prev.shape[1]
    assert wx.shape == (In, 4 * H) and wh.shape == (H, 4 * H) and b.shape == (1, 4 * H)

    # Batch tiling: a single full-B block for small batches; 8-aligned tiles otherwise.
    if block_b is None:
        block_b = B if B <= 256 else 256
    if block_b != B:
        assert B % block_b == 0 and block_b % 8 == 0, "batch tile must be 8-aligned"
    grid = (pl.cdiv(B, block_b),)

    out_shape = (
        jax.ShapeDtypeStruct((B, H), jnp.float32),   # h_t
        jax.ShapeDtypeStruct((B, H), jnp.float32),   # c_t
    )
    return pl.pallas_call(
        _lstm_cell_kernel,
        out_shape=out_shape,
        grid=grid,
        in_specs=[
            pl.BlockSpec((block_b, In), lambda i: (i, 0)),       # x_t
            pl.BlockSpec((block_b, H), lambda i: (i, 0)),        # h_prev
            pl.BlockSpec((block_b, H), lambda i: (i, 0)),        # c_prev
            pl.BlockSpec((In, 4 * H), lambda i: (0, 0)),         # fused input weights
            pl.BlockSpec((H, 4 * H), lambda i: (0, 0)),          # fused hidden weights
            pl.BlockSpec((1, 4 * H), lambda i: (0, 0)),          # fused bias row
        ],
        out_specs=(
            pl.BlockSpec((block_b, H), lambda i: (i, 0)),
            pl.BlockSpec((block_b, H), lambda i: (i, 0)),
        ),
        compiler_params=pltpu.CompilerParams(dimension_semantics=("parallel",)),
    )(x_t, h_prev, c_prev, wx, wh, b)


# -------------------- parameter construction (PyTorch-layout -> fused) --------------------
def init_gate_params(key, input_size, hidden_size):
    """Per-gate nn.Linear params in PyTorch layout: weight [out, in], bias [out]."""
    bound_x = 1.0 / np.sqrt(input_size)
    bound_h = 1.0 / np.sqrt(hidden_size)
    names_x = ["input", "forget", "cell", "output"]
    keys = jax.random.split(key, 16)
    params = {}
    k = 0
    for name in names_x:
        params[f"{name}_gate.weight"] = jax.random.uniform(
            keys[k], (hidden_size, input_size), jnp.float32, -bound_x, bound_x); k += 1
        params[f"{name}_gate.bias"] = jax.random.uniform(
            keys[k], (hidden_size,), jnp.float32, -bound_x, bound_x); k += 1
        params[f"hidden_{name}_gate.weight"] = jax.random.uniform(
            keys[k], (hidden_size, hidden_size), jnp.float32, -bound_h, bound_h); k += 1
        params[f"hidden_{name}_gate.bias"] = jax.random.uniform(
            keys[k], (hidden_size,), jnp.float32, -bound_h, bound_h); k += 1
    return params


def fuse_params(params):
    """Fuse the 8 nn.Linear layers into Wx [In,4H], Wh [H,4H], b [1,4H] (gate order i,f,g,o).
    nn.Linear computes x @ W.T + b, so PyTorch weights are transposed here."""
    order = ["input", "forget", "cell", "output"]
    wx = jnp.concatenate([params[f"{n}_gate.weight"].T for n in order], axis=1)
    wh = jnp.concatenate([params[f"hidden_{n}_gate.weight"].T for n in order], axis=1)
    b = jnp.concatenate(
        [params[f"{n}_gate.bias"] + params[f"hidden_{n}_gate.bias"] for n in order], axis=0
    )[None, :]
    return wx, wh, b


# -------------------- pure-JAX reference --------------------
def lstm_cell_ref(x_t, h_prev, c_prev, wx, wh, b):
    gates = x_t @ wx + h_prev @ wh + b
    i_t, f_t, g_t, o_t = jnp.split(gates, 4, axis=1)
    i_t = jax.nn.sigmoid(i_t)
    f_t = jax.nn.sigmoid(f_t)
    g_t = jnp.tanh(g_t)
    o_t = jax.nn.sigmoid(o_t)
    c_t = f_t * c_prev + i_t * g_t
    h_t = o_t * jnp.tanh(c_t)
    return h_t, c_t


if __name__ == "__main__":
    key = jax.random.PRNGKey(0)
    kx, kh, kc, kp = jax.random.split(key, 4)

    B, INPUT, HIDDEN = 8, 64, 32
    x_t = jax.random.normal(kx, (B, INPUT), jnp.float32)
    h_prev = jax.random.normal(kh, (B, HIDDEN), jnp.float32)
    c_prev = jax.random.normal(kc, (B, HIDDEN), jnp.float32)

    gate_params = init_gate_params(kp, INPUT, HIDDEN)
    wx, wh, b = fuse_params(gate_params)          # one-time weight fusion (outside the kernel)

    step = jax.jit(lstm_cell)
    h_t, c_t = step(x_t, h_prev, c_prev, wx, wh, b)
    jax.block_until_ready((h_t, c_t))

    h_ref, c_ref = lstm_cell_ref(x_t, h_prev, c_prev, wx, wh, b)

    assert h_t.shape == (B, HIDDEN) and c_t.shape == (B, HIDDEN)
    assert jnp.all(jnp.isfinite(h_t)) and jnp.all(jnp.isfinite(c_t))
    assert jnp.allclose(h_t, h_ref, atol=1e-4, rtol=1e-4)
    assert jnp.allclose(c_t, c_ref, atol=1e-4, rtol=1e-4)
    print("KERNEL_OK")
</pallas_src>

<mosaic_0001>
module attributes {stable_mosaic.version = 11 : i64} {
  func.func @_lstm_cell_kernel(%arg0: i32, %arg1: memref<8x64xf32, #tpu.memory_space<vmem>>, %arg2: memref<8x32xf32, #tpu.memory_space<vmem>>, %arg3: memref<8x32xf32, #tpu.memory_space<vmem>>, %arg4: memref<64x128xf32, #tpu.memory_space<vmem>>, %arg5: memref<32x128xf32, #tpu.memory_space<vmem>>, %arg6: memref<1x128xf32, #tpu.memory_space<vmem>>, %arg7: memref<8x32xf32, #tpu.memory_space<vmem>>, %arg8: memref<8x32xf32, #tpu.memory_space<vmem>>) attributes {dimension_semantics = [#tpu.dimension_semantics<parallel>], iteration_bounds = array<i64: 1>, scalar_prefetch = 0 : i64, scratch_operands = 0 : i64, tpu.core_type = #tpu.core_type<tc>, window_params = [{transform_indices = @transform_0, window_bounds = array<i64: 8, 64>}, {transform_indices = @transform_1, window_bounds = array<i64: 8, 32>}, {transform_indices = @transform_2, window_bounds = array<i64: 8, 32>}, {pipeline_mode = #tpu.pipeline_mode<synchronous>, transform_indices = @transform_3, window_bounds = array<i64: 64, 128>}, {pipeline_mode = #tpu.pipeline_mode<synchronous>, transform_indices = @transform_4, window_bounds = array<i64: 32, 128>}, {pipeline_mode = #tpu.pipeline_mode<synchronous>, transform_indices = @transform_5, window_bounds = array<i64: 1, 128>}, {transform_indices = @transform_6, window_bounds = array<i64: 8, 32>}, {transform_indices = @transform_7, window_bounds = array<i64: 8, 32>}]} {
    %c0 = arith.constant 0 : index
    %c0_0 = arith.constant 0 : index
    %0 = vector.load %arg1[%c0, %c0_0] : memref<8x64xf32, #tpu.memory_space<vmem>>, vector<8x64xf32>
    %c0_1 = arith.constant 0 : index
    %c0_2 = arith.constant 0 : index
    %1 = vector.load %arg4[%c0_1, %c0_2] : memref<64x128xf32, #tpu.memory_space<vmem>>, vector<64x128xf32>
    %cst = arith.constant dense<0.000000e+00> : vector<8x128xf32>
    %2 = tpu.matmul %0, %1, %cst {dimension_numbers = #tpu.dot_dimension_numbers<[1], [0], [0], [1], [0, 0, 1, 1], [], []>} : vector<8x64xf32>, vector<64x128xf32>, vector<8x128xf32> -> vector<8x128xf32>
    %c0_3 = arith.constant 0 : index
    %c0_4 = arith.constant 0 : index
    %3 = vector.load %arg2[%c0_3, %c0_4] : memref<8x32xf32, #tpu.memory_space<vmem>>, vector<8x32xf32>
    %c0_5 = arith.constant 0 : index
    %c0_6 = arith.constant 0 : index
    %4 = vector.load %arg5[%c0_5, %c0_6] : memref<32x128xf32, #tpu.memory_space<vmem>>, vector<32x128xf32>
    %cst_7 = arith.constant dense<0.000000e+00> : vector<8x128xf32>
    %5 = tpu.matmul %3, %4, %cst_7 {dimension_numbers = #tpu.dot_dimension_numbers<[1], [0], [0], [1], [0, 0, 1, 1], [], []>} : vector<8x32xf32>, vector<32x128xf32>, vector<8x128xf32> -> vector<8x128xf32>
    %6 = arith.addf %2, %5 : vector<8x128xf32>
    %c0_8 = arith.constant 0 : index
    %c0_9 = arith.constant 0 : index
    %7 = vector.load %arg6[%c0_8, %c0_9] : memref<1x128xf32, #tpu.memory_space<vmem>>, vector<1x128xf32>
    %8 = vector.broadcast %7 : vector<1x128xf32> to vector<8x128xf32>
    %9 = arith.addf %6, %8 : vector<8x128xf32>
    %10 = vector.extract_strided_slice %9 {offsets = [0, 0], sizes = [8, 32], strides = [1, 1]} : vector<8x128xf32> to vector<8x32xf32>
    %11 = arith.negf %10 : vector<8x32xf32>
    %12 = math.exp %11 : vector<8x32xf32>
    %cst_10 = arith.constant 1.000000e+00 : f32
    %13 = vector.broadcast %cst_10 : f32 to vector<8x32xf32>
    %14 = arith.addf %13, %12 : vector<8x32xf32>
    %15 = arith.divf %13, %14 : vector<8x32xf32>
    %16 = vector.extract_strided_slice %9 {offsets = [0, 32], sizes = [8, 32], strides = [1, 1]} : vector<8x128xf32> to vector<8x32xf32>
    %17 = arith.negf %16 : vector<8x32xf32>
    %18 = math.exp %17 : vector<8x32xf32>
    %cst_11 = arith.constant 1.000000e+00 : f32
    %19 = vector.broadcast %cst_11 : f32 to vector<8x32xf32>
    %20 = arith.addf %19, %18 : vector<8x32xf32>
    %21 = arith.divf %19, %20 : vector<8x32xf32>
    %22 = vector.extract_strided_slice %9 {offsets = [0, 64], sizes = [8, 32], strides = [1, 1]} : vector<8x128xf32> to vector<8x32xf32>
    %23 = math.tanh %22 : vector<8x32xf32>
    %24 = vector.extract_strided_slice %9 {offsets = [0, 96], sizes = [8, 32], strides = [1, 1]} : vector<8x128xf32> to vector<8x32xf32>
    %25 = arith.negf %24 : vector<8x32xf32>
    %26 = math.exp %25 : vector<8x32xf32>
    %cst_12 = arith.constant 1.000000e+00 : f32
    %27 = vector.broadcast %cst_12 : f32 to vector<8x32xf32>
    %28 = arith.addf %27, %26 : vector<8x32xf32>
    %29 = arith.divf %27, %28 : vector<8x32xf32>
    %c0_13 = arith.constant 0 : index
    %c0_14 = arith.constant 0 : index
    %30 = vector.load %arg3[%c0_13, %c0_14] : memref<8x32xf32, #tpu.memory_space<vmem>>, vector<8x32xf32>
    %31 = arith.mulf %21, %30 : vector<8x32xf32>
    %32 = arith.mulf %15, %23 : vector<8x32xf32>
    %33 = arith.addf %31, %32 : vector<8x32xf32>
    %34 = math.tanh %33 : vector<8x32xf32>
    %35 = arith.mulf %29, %34 : vector<8x32xf32>
    %c0_15 = arith.constant 0 : index
    %c0_16 = arith.constant 0 : index
    %36 = vector.load %arg7[%c0_15, %c0_16] : memref<8x32xf32, #tpu.memory_space<vmem>>, vector<8x32xf32>
    tpu.vector_store %arg7[%c0_15, %c0_16], %35 {strides = array<i32>} : memref<8x32xf32, #tpu.memory_space<vmem>>, vector<8x32xf32>,
    %c0_17 = arith.constant 0 : index
    %c0_18 = arith.constant 0 : index
    %37 = vector.load %arg8[%c0_17, %c0_18] : memref<8x32xf32, #tpu.memory_space<vmem>>, vector<8x32xf32>
    tpu.vector_store %arg8[%c0_17, %c0_18], %33 {strides = array<i32>} : memref<8x32xf32, #tpu.memory_space<vmem>>, vector<8x32xf32>,
    return
  }
  func.func @transform_0(%arg0: i32) -> (i32, i32) {
    %c0_i32 = arith.constant 0 : i32
    %c0_i32_0 = arith.constant 0 : i32
    return %arg0, %c0_i32 : i32, i32
  }
  func.func @transform_1(%arg0: i32) -> (i32, i32) {
    %c0_i32 = arith.constant 0 : i32
    %c0_i32_0 = arith.constant 0 : i32
    return %arg0, %c0_i32 : i32, i32
  }
  func.func @transform_2(%arg0: i32) -> (i32, i32) {
    %c0_i32 = arith.constant 0 : i32
    %c0_i32_0 = arith.constant 0 : i32
    return %arg0, %c0_i32 : i32, i32
  }
  func.func @transform_3(%arg0: i32) -> (i32, i32) {
    %c0_i32 = arith.constant 0 : i32
    %c0_i32_0 = arith.constant 0 : i32
    %c0_i32_1 = arith.constant 0 : i32
    return %c0_i32, %c0_i32_0 : i32, i32
  }
  func.func @transform_4(%arg0: i32) -> (i32, i32) {
    %c0_i32 = arith.constant 0 : i32
    %c0_i32_0 = arith.constant 0 : i32
    %c0_i32_1 = arith.constant 0 : i32
    return %c0_i32, %c0_i32_0 : i32, i32
  }
  func.func @transform_5(%arg0: i32) -> (i32, i32) {
    %c0_i32 = arith.constant 0 : i32
    %c0_i32_0 = arith.constant 0 : i32
    %c0_i32_1 = arith.constant 0 : i32
    return %c0_i32, %c0_i32_0 : i32, i32
  }
  func.func @transform_6(%arg0: i32) -> (i32, i32) {
    %c0_i32 = arith.constant 0 : i32
    %c0_i32_0 = arith.constant 0 : i32
    return %arg0, %c0_i32 : i32, i32
  }
  func.func @transform_7(%arg0: i32) -> (i32, i32) {
    %c0_i32 = arith.constant 0 : i32
    %c0_i32_0 = arith.constant 0 : i32
    return %arg0, %c0_i32 : i32, i32
  }
}

</mosaic_0001>

<bundles_post_ra>
// kernel: lstm_cell.1
= control target key start
LH: loop header
LB: loop body
LE: loop exit
PB: predicated region body
PF: predicated region fallthrough
CT: control target
= control target key end

     0   :  { %13 = vsyncpa [#allocation3], 0  ;;  %s740_s0 = inlined_call_operand.hbm [shape: f32[8,64], index: 0, kind: input, shape index: {}]   ;;  %s741_s1 = inlined_call_operand.hbm [shape: f32[8,32], index: 1, kind: input, shape index: {}]   ;;  %s742_s2 = inlined_call_operand.hbm [shape: f32[8,32], index: 2, kind: input, shape index: {}]   ;;  %s743_s3 = inlined_call_operand.hbm [shape: f32[64,128], index: 3, kind: input, shape index: {}]   ;;  %s744_s4 = inlined_call_operand.hbm [shape: f32[32,128], index: 4, kind: input, shape index: {}]   ;;  %s745_s5 = inlined_call_operand.vmem [shape: f32[1,128], index: 5, kind: input, shape index: {}]   ;;  %s746_s6 = inlined_call_operand.hbm [shape: f32[8,32], index: 6, kind: output, shape index: {0}]   ;;  %s747_s7 = inlined_call_operand.hbm [shape: f32[8,32], index: 7, kind: output, shape index: {1}]  }
   0x1   :  { %14 = vsyncpa [#allocation6], 0 }
   0x2   :  { %15 = vsyncpa [#allocation9], 0 }
   0x3   :  { %16 = vsyncpa [#allocation4], 0 }
   0x4   :  { %17 = vsyncpa [#allocation13], 0  ;;  %s582_s24 = smov [#allocation5]   ;;  %s583_s26 = smov [#allocation8]  }
   0x5   :  { %s34_s25 = sshll.u32 %s582_s24, 4  ;;  %s53_s27 = sshll.u32 %s583_s26, 4  ;;  %s35_s25 = int_to_ptr.vmem [resolvable:$true] %s34_s25  ;;  %s637_s27 = int_to_ptr.vmem [resolvable:$true] %s53_s27 }
   0x6   :  { %s418_s30 = scalar_lea.hbm %s741_s1, 128 }
   0x7   :  { %p419_p0 = scmp.ne.s32.totalorder %s741_s1, %s418_s30  ;;  %p422_p1 = scmp.lt.u32.totalorder %s418_s30, %s741_s1 }
   0x9   :  { %p424_p2 = pnand %p422_p1, %p419_p0 }
   0xb   :  { %427 = shalt.err (!%p424_p2)
}
   0xc   :  { %s428_s12 = scalar_lea.vmem %s35_s25, 128  ;;  %p433_p4 = scmp.lt.s32.totalorder %s35_s25, %s35_s25 }
   0xd   :  { %p429_p3 = scmp.ne.s32.totalorder %s35_s25, %s428_s12  ;;  %p434_p5 = scmp.lt.s32.totalorder %s428_s12, %s428_s12 }
   0xf   :  { %p435_p6 = por %p434_p5, %p433_p4 }
  0x11   :  { %p436_p7 = pnand %p435_p6, %p429_p3 }
  0x13   :  { %439 = shalt.err (!%p436_p7)
}
  0x14   :  { %37 = dma.hbm_to_vmem [thread:$0]  %s741_s1, 128, %s35_s25, [#allocation6]  }
  0x15   :  { %s440_s17 = scalar_lea.hbm %s743_s3, 1024 }
  0x16   :  { %p441_p8 = scmp.ne.s32.totalorder %s743_s3, %s440_s17  ;;  %p444_p9 = scmp.lt.u32.totalorder %s440_s17, %s743_s3 }
  0x18   :  { %p446_p10 = pnand %p444_p9, %p441_p8 }
  0x1a   :  { %449 = shalt.err (!%p446_p10)
}
  0x1b   :  { %s450_s22 = scalar_lea.vmem %s637_s27, 1024  ;;  %p455_p12 = scmp.lt.s32.totalorder %s637_s27, %s637_s27 }
  0x1c   :  { %p451_p11 = scmp.ne.s32.totalorder %s637_s27, %s450_s22  ;;  %p456_p13 = scmp.lt.s32.totalorder %s450_s22, %s450_s22 }
  0x1e   :  { %p457_p0 = por %p456_p13, %p455_p12 }
  0x20   :  { %p458_p1 = pnand %p457_p0, %p451_p11 }
  0x22   :  { %461 = shalt.err (!%p458_p1)
}
  0x23   :  { %s584_s1 = smov 128   ;;  %s585_s23 = smov 8  }
  0x24   :  { %59 = dma.hbm_to_vmem [thread:$0]  %s743_s3, 1024, %s637_s27, [#allocation9], %s584_s1, %s584_s1, %s585_s23  }
  0x25   :  { %s586_s26 = smov [#allocation2]   ;;  %s587_s29 = smov [#allocation7]  }
  0x26   :  { %s24_s28 = sshll.u32 %s586_s26, 4  ;;  %s44_s30 = sshll.u32 %s587_s29, 4  ;;  %s25_s28 = int_to_ptr.vmem [resolvable:$true] %s24_s28  ;;  %s45_s30 = int_to_ptr.vmem [resolvable:$true] %s44_s30 }
  0x27   :  { %s462_s10 = scalar_lea.hbm %s740_s0, 128 }
  0x28   :  { %p463_p2 = scmp.ne.s32.totalorder %s740_s0, %s462_s10  ;;  %p466_p3 = scmp.lt.u32.totalorder %s462_s10, %s740_s0 }
  0x2a   :  { %p468_p4 = pnand %p466_p3, %p463_p2 }
  0x2c   :  { %471 = shalt.err (!%p468_p4)
}
  0x2d   :  { %s472_s3 = scalar_lea.vmem %s25_s28, 128  ;;  %p477_p6 = scmp.lt.s32.totalorder %s25_s28, %s25_s28 }
  0x2e   :  { %p473_p5 = scmp.ne.s32.totalorder %s25_s28, %s472_s3  ;;  %p478_p7 = scmp.lt.s32.totalorder %s472_s3, %s472_s3 }
  0x30   :  { %p479_p8 = por %p478_p7, %p477_p6 }
  0x32   :  { %p480_p9 = pnand %p479_p8, %p473_p5 }
  0x34   :  { %483 = shalt.err (!%p480_p9)
}
  0x35   :  { %27 = dma.hbm_to_vmem [thread:$0]  %s740_s0, 128, %s25_s28, [#allocation3]  }
  0x36   :  { %s484_s18 = scalar_lea.hbm %s742_s2, 128 }
  0x37   :  { %p485_p10 = scmp.ne.s32.totalorder %s742_s2, %s484_s18  ;;  %p488_p11 = scmp.lt.u32.totalorder %s484_s18, %s742_s2 }
  0x39   :  { %p490_p12 = pnand %p488_p11, %p485_p10 }
  0x3b   :  { %493 = shalt.err (!%p490_p12)
}
  0x3c   :  { %s494_s24 = scalar_lea.vmem %s45_s30, 128  ;;  %p499_p0 = scmp.lt.s32.totalorder %s45_s30, %s45_s30 }
  0x3d   :  { %p495_p13 = scmp.ne.s32.totalorder %s45_s30, %s494_s24  ;;  %p500_p1 = scmp.lt.s32.totalorder %s494_s24, %s494_s24 }
  0x3f   :  { %p501_p2 = por %p500_p1, %p499_p0 }
  0x41   :  { %p502_p3 = pnand %p501_p2, %p495_p13 }
  0x43   :  { %505 = shalt.err (!%p502_p3)
}
  0x44   :  { %47 = dma.hbm_to_vmem [thread:$0]  %s742_s2, 128, %s45_s30, [#allocation6]  }
  0x45   :  { %s588_s26 = smov [#allocation10]   ;;  %s506_s9 = scalar_lea.hbm %s744_s4, 512 }
  0x46   :  { %s65_s28 = sshll.u32 %s588_s26, 4  ;;  %p507_p4 = scmp.ne.s32.totalorder %s744_s4, %s506_s9  ;;  %s66_s28 = int_to_ptr.vmem [resolvable:$true] %s65_s28 }
  0x47   :  { %p510_p5 = scmp.lt.u32.totalorder %s506_s9, %s744_s4 }
  0x49   :  { %p512_p6 = pnand %p510_p5, %p507_p4 }
  0x4b   :  { %515 = shalt.err (!%p512_p6)
}
  0x4c   :  { %s516_s14 = scalar_lea.vmem %s66_s28, 512  ;;  %p521_p8 = scmp.lt.s32.totalorder %s66_s28, %s66_s28 }
  0x4d   :  { %p517_p7 = scmp.ne.s32.totalorder %s66_s28, %s516_s14  ;;  %p522_p9 = scmp.lt.s32.totalorder %s516_s14, %s516_s14 }
  0x4f   :  { %p523_p10 = por %p522_p9, %p521_p8 }
  0x51   :  { %p524_p11 = pnand %p523_p10, %p517_p7 }
  0x53   :  { %527 = shalt.err (!%p524_p11)
}
  0x54   :  { %71 = dma.hbm_to_vmem [thread:$0]  %s744_s4, 512, %s66_s28, [#allocation9], %s584_s1, %s584_s1, %s585_s23  }
  0x55   :  { %572 = dma.done.wait [#allocation3], 128  }
  0x56   :  { %573 = vsyncadd [#allocation3], 4294967168 }
  0x57   :  { %574 = dma.done.wait [#allocation6], 256  }
  0x58   :  { %575 = vsyncadd [#allocation6], 4294967040 }
  0x59   :  { %576 = dma.done.wait [#allocation9], 1536  }
  0x5a   :  { %577 = vsyncadd [#allocation9], 4294965760  ;;  %v589_v0 = vmov 0.0|0.0   ;;  %vm590_vm0 = vmmov 0   ;;  %v591_v1 = vmov 0.0   ;;  %v90_v2 = vld [vmem:[#allocation8] sm:$0xff] }
  0x5b   :  { %383 = vmatprep.subr.bf16.mxu1 %v589_v0  ;;  %377 = vmatprep.subr.bf16.mxu0 %v589_v0  ;;  %v91_v3 = vld [vmem:[#allocation8 + $0x8] sm:$0xff]  ;;  %v92_v4 = vld [vmem:[#allocation8 + $0x10] sm:$0xff]  ;;  %v93_v6 = vld [vmem:[#allocation8 + $0x18] sm:$0xff]  ;;  %vm103_vm1 = vcmask 261120   ;;  %vm177_vm2 = vcmask 523264   ;;  %s592_s23 = smov 64  }
  0x5c   :  { %355 = vmatprep.mubr.msk.f32.mxu0 %vm590_vm0, %v591_v1  ;;  %374 = vmatprep.mubr.msk.f32.mxu1 %vm590_vm0, %v591_v1  ;;  %v384_v5 = vpack.c.bf16 %v91_v3, %v90_v2  ;;  %v99_v7 = vld [vmem:[#allocation10] sm:$0xff]  ;;  %v100_v8 = vld [vmem:[#allocation10 + $0x8] sm:$0xff]  ;;  %v101_v10 = vld [vmem:[#allocation10 + $0x10] sm:$0xff]  ;;  %v387_v11 = vpack.c.bf16 %v93_v6, %v92_v4  ;;  %s593_s3 = smov 32   ;;  %s595_s27 = smov [#allocation12]  }
  0x5d   :  { %v378_v9 = vpack.c.bf16 %v100_v8, %v99_v7  ;;  %v102_v12 = vld [vmem:[#allocation10 + $0x18] sm:$0xff]  ;;  %v94_v13 = vld [vmem:[#allocation8 + $0x20] sm:$0xff]  ;;  %v95_v14 = vld [vmem:[#allocation8 + $0x28] sm:$0xff]  ;;  %s314_s15 = sshll.u32 %s595_s27, 4  ;;  %s315_s15 = int_to_ptr.vmem [resolvable:$true] %s314_s15 }
  0x5e   :  { %385 = vmatpush3.bf16.msra.mxu1 %v384_v5  ;;  %v381_v15 = vpack.c.bf16 %v102_v12, %v101_v10  ;;  %v390_v16 = vpack.c.bf16 %v95_v14, %v94_v13  ;;  %v96_v17 = vld [vmem:[#allocation8 + $0x30] sm:$0xff]  ;;  %v97_v18 = vld [vmem:[#allocation8 + $0x38] sm:$0xff]  ;;  %v89_v21 = vld [vmem:[#allocation2] sm:$0xff]  ;;  %s528_s16 = scalar_lea.vmem %s315_s15, 128  ;;  %p533_p13 = scmp.lt.s32.totalorder %s315_s15, %s315_s15 }
  0x5f   :  { %386 = vmatprep.subr.bf16.mxu1 %v589_v0  ;;  %379 = vmatpush3.bf16.msra.mxu0 %v378_v9  ;;  %v98_v19 = vld [vmem:[#allocation5] sm:$0xff]  ;;  %v393_v20 = vpack.c.bf16 %v97_v18, %v96_v17  ;;  %v331_v25 = vld [vmem:[%s745_s5] ss:$0 sm:$0xff]  ;;  %v266_v30 = vld [vmem:[#allocation7] sm:$0xff]  ;;  %s594_s5 = smov 96   ;;  %p529_p12 = scmp.ne.s32.totalorder %s315_s15, %s528_s16 }
  0x60   :  { %380 = vmatprep.subr.bf16.mxu0 %v589_v0  ;;  %p534_p0 = scmp.lt.s32.totalorder %s528_s16, %s528_s16 }
  0x62   :  { %388 = vmatpush3.bf16.msra.mxu1 %v387_v11  ;;  %p535_p1 = por %p534_p0, %p533_p13 }
  0x63   :  { %389 = vmatprep.subr.bf16.mxu1 %v589_v0  ;;  %382 = vmatpush3.bf16.msra.mxu0 %v381_v15 }
  0x64   :  { %p536_p2 = pnand %p535_p1, %p529_p12 }
  0x66   :  { %391 = vmatpush3.bf16.msra.mxu1 %v390_v16  ;;  %356 = vmatmul.mubr.msk.f32.vlgmr.msra.gmra.mrb[0].mxu0 %vm103_vm1, %v98_v19 }
  0x67   :  { %392 = vmatprep.subr.bf16.mxu1 %v589_v0 }
  0x6a   :  { %394 = vmatpush3.bf16.msra.mxu1 %v393_v20 }
  0x6d   :  { %375 = vmatmul.mubr.msk.f32.vlgmr.msra.gmra.mrb[0].mxu1 %vm177_vm2, %v89_v21 }
 0x139   :  { %v173_v22 = vpop.f32.mrb[0].mxu0 }
 0x13a   :  { %v357_v23 = vpop.f32.mrb[1].mxu0 }
 0x140   :  { %v247_v24 = vpop.f32.mrb[0].mxu1 }
 0x141   :  { %v248_v26 = vadd.f32 %v247_v24, %v173_v22  ;;  %v376_v27 = vpop.f32.mrb[1].mxu1 }
 0x143   :  { %v258_v28 = vadd.f32 %v331_v25, %v248_v26 }
 0x145   :  { %410 = vtanh.f32 %v258_v28  ;;  %v332_v31 = vmul.f32 -1.442695, %v258_v28 }
 0x147   :  { %412 = vpow2.f32 %v332_v31 }
 0x14f   :  { %v411_v29 = vpop.eup %410 }
 0x150   :  { %273 = vrot.lane.b32.xlu0 %v411_v29, %s592_s23 }
 0x151   :  { %v413_v32 = vpop.eup %412 }
 0x152   :  { %v262_v33 = vadd.f32 1.0, %v413_v32 }
 0x154   :  { %268 = vrot.lane.b32.xlu0 %v266_v30, %s593_s3  ;;  %414 = vrcp.f32 %v262_v33 }
 0x15e   :  { %v415_v34 = vpop.eup %414 }
 0x1c2   :  { %v274_v35 = vpop.permute.xlu0 %273 }
 0x1c3   :  { %v276_v36 = vmul.f32 %v415_v34, %v274_v35 }
 0x1c5   :  { %278 = vrot.lane.b32.xlu1 %v276_v36, %s593_s3 }
 0x1c6   :  { %v269_v37 = vpop.permute.xlu0 %268 }
 0x1c7   :  { %v271_v38 = vmul.f32 %v415_v34, %v269_v37 }
 0x237   :  { %v279_v39 = vpop.permute.xlu1 %278 }
 0x238   :  { %v281_v40 = vadd.f32 %v279_v39, %v271_v38 }
 0x23a   :  { %416 = vtanh.f32 %v281_v40 }
 0x244   :  { %v417_v41 = vpop.eup %416 }
 0x245   :  { %284 = vrot.lane.b32.xlu1 %v417_v41, %s592_s23 }
 0x249   :  { %294 = vrot.lane.b32.xlu1 %v281_v40, %s594_s5 }
 0x2b7   :  { %v285_v42 = vpop.permute.xlu1 %284 }
 0x2b8   :  { %v287_v43 = vmul.f32 %v415_v34, %v285_v42 }
 0x2ba   :  { %289 = vrot.lane.b32.xlu0 %v287_v43, %s593_s3 }
 0x2bb   :  { %v295_v44 = vpop.permute.xlu1 %294 }
 0x2bc   :  { %297 = vst.msk [vmem:[#allocation12] sm:$0xff] %vm103_vm1, %v295_v44 }
 0x2bd   :  { %539 = shalt.err (!%p536_p2)
}
 0x2be   :  { %s540_s19 = scalar_lea.hbm %s747_s7, 128 }
 0x2bf   :  { %p541_p3 = scmp.ne.s32.totalorder %s747_s7, %s540_s19  ;;  %p544_p4 = scmp.lt.u32.totalorder %s540_s19, %s747_s7 }
 0x2c1   :  { %p546_p5 = pnand %p544_p4, %p541_p3 }
 0x2c3   :  { %549 = shalt.err (!%p546_p5)
}
 0x2c4   :  { %317 = dma.vmem_to_hbm [thread:$0]  %s315_s15, 128, %s747_s7, [#allocation13]  }
 0x2c5   :  { %s596_s26 = smov [#allocation11]  }
 0x2c6   :  { %s304_s28 = sshll.u32 %s596_s26, 4  ;;  %s305_s28 = int_to_ptr.vmem [resolvable:$true] %s304_s28 }
 0x2c7   :  { %s550_s29 = scalar_lea.vmem %s305_s28, 128  ;;  %p555_p7 = scmp.lt.s32.totalorder %s305_s28, %s305_s28 }
 0x2c8   :  { %p551_p6 = scmp.ne.s32.totalorder %s305_s28, %s550_s29  ;;  %p556_p8 = scmp.lt.s32.totalorder %s550_s29, %s550_s29 }
 0x2ca   :  { %p557_p9 = por %p556_p8, %p555_p7 }
 0x2cc   :  { %p558_p10 = pnand %p557_p9, %p551_p6 }
 0x32c   :  { %v290_v45 = vpop.permute.xlu0 %289 }
 0x32d   :  { %292 = vst.msk [vmem:[#allocation11] sm:$0xff] %vm103_vm1, %v290_v45 }
 0x32e   :  { %561 = shalt.err (!%p558_p10)
}
 0x32f   :  { %s562_s10 = scalar_lea.hbm %s746_s6, 128 }
 0x330   :  { %p563_p11 = scmp.ne.s32.totalorder %s746_s6, %s562_s10  ;;  %p566_p12 = scmp.lt.u32.totalorder %s562_s10, %s746_s6 }
 0x332   :  { %p568_p13 = pnand %p566_p12, %p563_p11 }
 0x334   :  { %571 = shalt.err (!%p568_p13)
}
 0x335   :  { %307 = dma.vmem_to_hbm [thread:$0]  %s305_s28, 128, %s746_s6, [#allocation4]  }
 0x336   :  { %578 = dma.done.wait [#allocation4], 128  }
 0x337   :  { %579 = vsyncadd [#allocation4], 4294967168 }
 0x338   :  { %580 = dma.done.wait [#allocation13], 128  }
 0x339   :  { %581 = vsyncadd [#allocation13], 4294967168 }
 0x33a   :  { %324 = vsyncpa [#allocation3], 1 }
 0x33b   :  { %325 = vsyncpa [#allocation6], 1 }
 0x33c   :  { %326 = vsyncpa [#allocation9], 1 }
 0x33d   :  { %327 = vsyncpa [#allocation4], 1 }
 0x33e   :  { %328 = vsyncpa [#allocation13], 1 }

</bundles_post_ra>
